<compile_context>
chip_gen: v6e
topology: v6e:2x2x1
jax: 0.10.0
libtpu: 0.0.40
codegen_flags: <defaults>
</compile_context>

<pallas_src>
import functools
import math

import jax
import jax.numpy as jnp
from jax.experimental import pallas as pl
from jax.experimental.pallas import tpu as pltpu


def _build_pe(max_len: int, d_model: int) -> jnp.ndarray:
    """Deterministic sinusoidal positional-encoding table, shape (max_len, 1, d_model)."""
    position = jnp.arange(max_len, dtype=jnp.float32)[:, None]              # (max_len, 1)
    div_term = jnp.exp(jnp.arange(0, d_model, 2, dtype=jnp.float32)
                       * (-math.log(10000.0) / d_model))                    # (d_model/2,)
    ang = position * div_term                                               # (max_len, d_model/2)
    pe = jnp.zeros((max_len, d_model), dtype=jnp.float32)
    pe = pe.at[:, 0::2].set(jnp.sin(ang))
    pe = pe.at[:, 1::2].set(jnp.cos(ang))
    return pe[:, None, :]                                                   # (max_len, 1, d_model)


def _pe_add_kernel(scale_ref, x_ref, pe_ref, o_ref):
    # scale_ref: (1,) f32 in SMEM.
    # x_ref / o_ref: (block_s, B, D) VMEM tiles; pe_ref: (block_s, 1, D) VMEM
    # tile, broadcast over the batch axis by the add (sublane broadcast).
    o_ref[...] = (x_ref[...] + scale_ref[0] * pe_ref[...]).astype(o_ref.dtype)
    # TODO(synk): nn.Dropout(p=0.1) applied as identity (eval-mode semantics);
    # training parity would need an in-kernel pltpu.prng_seed/prng_random_bits mask.


def _choose_block_s(seq_len: int, batch: int, d_model: int, itemsize: int,
                    target_tile_bytes: int = 2 << 20) -> int:
    """~2 MiB sublane-aligned (block_s, B, D) x tiles.

    Double-buffered x + out + pe tiles (~8-10 MiB) fit the default scoped VMEM
    on v5e (16 MiB) and v6e/v7x (32 MiB per TC) with no vmem_limit_bytes flag.
    (For very large B*D a single 8-row tile can exceed this budget; such shapes
    would additionally need a D tile, which this op does not require here.)
    """
    sub = 16 if itemsize == 2 else 8                     # dense sublane tiling
    bs = max(sub, target_tile_bytes // max(1, batch * d_model * itemsize))
    bs = (bs // sub) * sub
    return max(1, min(bs, seq_len))


@functools.partial(jax.jit, static_argnames=("block_s",))
def positional_encoding(x: jnp.ndarray, pe: jnp.ndarray, scale: jnp.ndarray,
                        *, block_s: int | None = None) -> jnp.ndarray:
    """x: (S, B, D); pe: (max_len, 1, D) float32; scale: (1,) float32."""
    S, B, D = x.shape

    # Cast the (small) pe table to the activation dtype once, outside the
    # kernel (avoids a per-tile convert; halves pe traffic for bf16).
    pe = pe.astype(x.dtype)
    scale = scale.astype(jnp.float32)

    if block_s is None:
        block_s = _choose_block_s(S, B, D, jnp.dtype(x.dtype).itemsize)
    block_s = min(block_s, S)

    grid = (pl.cdiv(S, block_s),)            # S-tiles only; B folded into the tile.
                                             # Partial last S-block (non-divisible S)
                                             # is handled by masked block reads/writes;
                                             # pe rows stay aligned since max_len >= S.

    out = pl.pallas_call(
        _pe_add_kernel,
        out_shape=jax.ShapeDtypeStruct((S, B, D), x.dtype),
        grid_spec=pltpu.PrefetchScalarGridSpec(
            num_scalar_prefetch=0,
            grid=grid,
            in_specs=[
                pl.BlockSpec(memory_space=pltpu.MemorySpace.SMEM),       # scale
                pl.BlockSpec((block_s, B, D), lambda s: (s, 0, 0)),      # x
                pl.BlockSpec((block_s, 1, D), lambda s: (s, 0, 0)),      # pe
            ],
            out_specs=pl.BlockSpec((block_s, B, D), lambda s: (s, 0, 0)),
        ),
        compiler_params=pltpu.CompilerParams(
            dimension_semantics=("parallel",)),  # lets v7x shard S-tiles over its 2 TCs
        # Output aliases the caller's actual x buffer (truly in-place when the
        # caller donates x; XLA inserts a copy otherwise).
        input_output_aliases={1: 0},
    )(scale, x, pe)

    return out


if __name__ == "__main__":
    key = jax.random.PRNGKey(0)
    MAX_LEN = 50

    def ref_fn(x, pe, scale):
        return (x.astype(jnp.float32)
                + scale[0].astype(jnp.float32) * pe[: x.shape[0]].astype(jnp.float32))

    # Primary small-shape test (seq=8, batch=2, hidden=32), scale init = ones.
    S, B, D = 8, 2, 32
    k1, k2, k3, k4 = jax.random.split(key, 4)
    x = jax.random.normal(k1, (S, B, D), dtype=jnp.float32)
    pe = _build_pe(MAX_LEN, D)
    scale = jnp.ones((1,), dtype=jnp.float32)       # nn.Parameter(torch.ones(1))
    out = jax.block_until_ready(positional_encoding(x, pe, scale))
    assert out.shape == (S, B, D)
    assert jnp.allclose(out, ref_fn(x, pe, scale), atol=1e-6, rtol=1e-6)

    # Lane-dense hidden dim (D = 128) with a non-unit scale.
    S2, B2, D2 = 16, 2, 128
    x2 = jax.random.normal(k2, (S2, B2, D2), dtype=jnp.float32)
    pe2 = _build_pe(MAX_LEN, D2)
    scale2 = jnp.full((1,), 0.75, dtype=jnp.float32)
    out2 = jax.block_until_ready(positional_encoding(x2, pe2, scale2))
    assert jnp.allclose(out2, ref_fn(x2, pe2, scale2), atol=1e-6, rtol=1e-6)

    # Non-divisible S (partial last S-tile), forced small block_s.
    S3, B3, D3 = 20, 2, 128
    x3 = jax.random.normal(k3, (S3, B3, D3), dtype=jnp.float32)
    pe3 = _build_pe(MAX_LEN, D3)
    scale3 = jnp.full((1,), -0.5, dtype=jnp.float32)
    out3 = jax.block_until_ready(positional_encoding(x3, pe3, scale3, block_s=8))
    assert jnp.allclose(out3, ref_fn(x3, pe3, scale3), atol=1e-6, rtol=1e-6)

    # bf16 activation path (pe cast once in the wrapper, compute dtype-safe).
    S4, B4, D4 = 16, 2, 128
    x4 = jax.random.normal(k4, (S4, B4, D4), dtype=jnp.float32).astype(jnp.bfloat16)
    pe4 = _build_pe(MAX_LEN, D4)
    scale4 = jnp.full((1,), 1.25, dtype=jnp.float32)
    out4 = jax.block_until_ready(positional_encoding(x4, pe4, scale4))
    assert out4.dtype == jnp.bfloat16
    assert jnp.allclose(out4.astype(jnp.float32), ref_fn(x4, pe4, scale4),
                        atol=5e-2, rtol=5e-2)

    print("KERNEL_OK")
</pallas_src>

<mosaic_0001>
module attributes {stable_mosaic.version = 11 : i64} {
  func.func @_pe_add_kernel(%arg0: i32, %arg1: memref<1xf32, #tpu.memory_space<smem>>, %arg2: memref<8x2x32xf32, #tpu.memory_space<vmem>>, %arg3: memref<8x1x32xf32, #tpu.memory_space<vmem>>, %arg4: memref<8x2x32xf32, #tpu.memory_space<vmem>>) attributes {dimension_semantics = [#tpu.dimension_semantics<parallel>], iteration_bounds = array<i64: 1>, scalar_prefetch = 0 : i64, scratch_operands = 0 : i64, tpu.core_type = #tpu.core_type<tc>, window_params = [{transform_indices = @transform_0, window_bounds = array<i64: 1>}, {transform_indices = @transform_1, window_bounds = array<i64: 8, 2, 32>}, {transform_indices = @transform_2, window_bounds = array<i64: 8, 1, 32>}, {transform_indices = @transform_3, window_bounds = array<i64: 8, 2, 32>}]} {
    %c0 = arith.constant 0 : index
    %c0_0 = arith.constant 0 : index
    %c0_1 = arith.constant 0 : index
    %0 = vector.load %arg2[%c0, %c0_0, %c0_1] : memref<8x2x32xf32, #tpu.memory_space<vmem>>, vector<8x2x32xf32>
    %c0_2 = arith.constant 0 : index
    %1 = memref.load %arg1[%c0_2] : memref<1xf32, #tpu.memory_space<smem>>
    %c0_3 = arith.constant 0 : index
    %c0_4 = arith.constant 0 : index
    %c0_5 = arith.constant 0 : index
    %2 = vector.load %arg3[%c0_3, %c0_4, %c0_5] : memref<8x1x32xf32, #tpu.memory_space<vmem>>, vector<8x1x32xf32>
    %3 = vector.broadcast %1 : f32 to vector<8x1x32xf32>
    %4 = arith.mulf %3, %2 : vector<8x1x32xf32>
    %5 = vector.broadcast %4 : vector<8x1x32xf32> to vector<8x2x32xf32>
    %6 = arith.addf %0, %5 : vector<8x2x32xf32>
    %c0_6 = arith.constant 0 : index
    %c0_7 = arith.constant 0 : index
    %c0_8 = arith.constant 0 : index
    %7 = vector.load %arg4[%c0_6, %c0_7, %c0_8] : memref<8x2x32xf32, #tpu.memory_space<vmem>>, vector<8x2x32xf32>
    tpu.vector_store %arg4[%c0_6, %c0_7, %c0_8], %6 {strides = array<i32>} : memref<8x2x32xf32, #tpu.memory_space<vmem>>, vector<8x2x32xf32>,
    return
  }
  func.func @transform_0(%arg0: i32) -> i32 {
    %c0_i32 = arith.constant 0 : i32
    %c0_i32_0 = arith.constant 0 : i32
    return %c0_i32 : i32
  }
  func.func @transform_1(%arg0: i32) -> (i32, i32, i32) {
    %c0_i32 = arith.constant 0 : i32
    %c0_i32_0 = arith.constant 0 : i32
    %c0_i32_1 = arith.constant 0 : i32
    return %arg0, %c0_i32, %c0_i32_0 : i32, i32, i32
  }
  func.func @transform_2(%arg0: i32) -> (i32, i32, i32) {
    %c0_i32 = arith.constant 0 : i32
    %c0_i32_0 = arith.constant 0 : i32
    %c0_i32_1 = arith.constant 0 : i32
    return %arg0, %c0_i32, %c0_i32_0 : i32, i32, i32
  }
  func.func @transform_3(%arg0: i32) -> (i32, i32, i32) {
    %c0_i32 = arith.constant 0 : i32
    %c0_i32_0 = arith.constant 0 : i32
    %c0_i32_1 = arith.constant 0 : i32
    return %arg0, %c0_i32, %c0_i32_0 : i32, i32, i32
  }
}

</mosaic_0001>

<bundles_post_ra>
// kernel: positional_encoding.1
= control target key start
LH: loop header
LB: loop body
LE: loop exit
PB: predicated region body
PF: predicated region fallthrough
CT: control target
= control target key end

     0   :  { %9 = vsyncpa [#allocation4], 0  ;;  %s257_s0 = inlined_call_operand.<no memory space> [shape: f32[1], index: 0, kind: input, shape index: {}]   ;;  %s258_s1 = inlined_call_operand.hbm [shape: f32[8,2,32], index: 1, kind: input, shape index: {}, may-alias: {1,3}]   ;;  %s259_s2 = inlined_call_operand.vmem [shape: f32[50,1,32], index: 2, kind: input, shape index: {}]   ;;  %s260_s3 = inlined_call_operand.hbm [shape: f32[8,2,32], index: 3, kind: output, shape index: {}, may-alias: {1,3}]  }
   0x1   :  { %10 = vsyncpa [#allocation5], 0  ;;  %s186_s12 = smov [#allocation3]  }
   0x2   :  { %s18_s13 = sshll.u32 %s186_s12, 4  ;;  %s19_s13 = int_to_ptr.vmem [resolvable:$true] %s18_s13 }
   0x3   :  { %s150_s14 = scalar_lea.vmem %s19_s13, 256  ;;  %p155_p1 = scmp.lt.s32.totalorder %s19_s13, %s19_s13 }
   0x4   :  { %p151_p0 = scmp.ne.s32.totalorder %s19_s13, %s150_s14  ;;  %p156_p2 = scmp.lt.s32.totalorder %s150_s14, %s150_s14 }
   0x6   :  { %p157_p3 = por %p156_p2, %p155_p1 }
   0x8   :  { %p158_p4 = pnand %p157_p3, %p151_p0 }
   0xa   :  { %161 = shalt.err (!%p158_p4)
}
   0xb   :  { %s187_s15 = smov 32   ;;  %s188_s16 = smov 2  }
   0xc   :  { %24 = dma.hbm_to_vmem [thread:$0]  %s258_s1, 256, %s19_s13, [#allocation4], %s187_s15, %s187_s15, %s188_s16  }
   0xd   :  { %182 = dma.done.wait [#allocation4], 256  }
   0xe   :  { %183 = vsyncadd [#allocation4], 4294967040  ;;  %v64_v0 = vlaneseq  ;;  %v47_v2 = vstv %s257_s0  ;;  %v39_v4 = vld [vmem:[%s259_s2] sm:$0x1]  ;;  %vm112_vm0 = vcmask 254976   ;;  %s189_s8 = smov [#allocation6]  }
   0xf   :  { %v48_v5 = vmul.f32 %v47_v2, %v39_v4  ;;  %v40_v6 = vld [vmem:[%s259_s2 + $0x1] sm:$0x1]  ;;  %v41_v7 = vld [vmem:[%s259_s2 + $0x2] sm:$0x1]  ;;  %v42_v12 = vld [vmem:[%s259_s2 + $0x3] sm:$0x1] }
  0x10   :  { %v65_v1 = vshrl.u32 %v64_v0, 7  ;;  %v30_v8 = vld [vmem:[#allocation3] sm:$0x3]  ;;  %v31_v9 = vld [vmem:[#allocation3 + $0x2] sm:$0x3]  ;;  %v49_v10 = vmul.f32 %v47_v2, %v40_v6  ;;  %v50_v11 = vmul.f32 %v47_v2, %v41_v7  ;;  %v51_v15 = vmul.f32 %v47_v2, %v42_v12  ;;  %s126_s9 = sshll.u32 %s189_s8, 4  ;;  %s127_s9 = int_to_ptr.vmem [resolvable:$true] %s126_s9 }
  0x11   :  { %v32_v14 = vld [vmem:[#allocation3 + $0x4] sm:$0x3]  ;;  %v33_v20 = vld [vmem:[#allocation3 + $0x6] sm:$0x3]  ;;  %v34_v26 = vld [vmem:[#allocation3 + $0x8] sm:$0x3]  ;;  %p167_p6 = scmp.lt.s32.totalorder %s127_s9, %s127_s9 }
  0x12   :  { %v66_v3 = vsub.s32 0, %v65_v1  ;;  %v43_v16 = vld [vmem:[%s259_s2 + $0x4] sm:$0x1]  ;;  %v44_v17 = vld [vmem:[%s259_s2 + $0x5] sm:$0x1] }
  0x13   :  { %v52_v21 = vmul.f32 %v47_v2, %v43_v16  ;;  %v53_v22 = vmul.f32 %v47_v2, %v44_v17  ;;  %v45_v23 = vld [vmem:[%s259_s2 + $0x6] sm:$0x1]  ;;  %v35_v27 = vld [vmem:[#allocation3 + $0xa] sm:$0x3]  ;;  %v46_v29 = vld [vmem:[%s259_s2 + $0x7] sm:$0x1] }
  0x14   :  { %v67_v13 = vrot.slane %v48_v5, %v66_v3  ;;  %v71_v18 = vrot.slane %v49_v10, %v66_v3  ;;  %v75_v19 = vrot.slane %v50_v11, %v66_v3  ;;  %v79_v25 = vrot.slane %v51_v15, %v66_v3  ;;  %v36_v34 = vld [vmem:[#allocation3 + $0xc] sm:$0x3]  ;;  %v37_v40 = vld [vmem:[#allocation3 + $0xe] sm:$0x3]  ;;  %s162_s2 = scalar_lea.vmem %s127_s9, 256 }
  0x15   :  { %v54_v28 = vmul.f32 %v47_v2, %v45_v23  ;;  %v83_v32 = vrot.slane %v52_v21, %v66_v3  ;;  %v87_v33 = vrot.slane %v53_v22, %v66_v3  ;;  %v55_v37 = vmul.f32 %v47_v2, %v46_v29  ;;  %p163_p5 = scmp.ne.s32.totalorder %s127_s9, %s162_s2  ;;  %p168_p7 = scmp.lt.s32.totalorder %s162_s2, %s162_s2 }
  0x16   :  { %v104_v24 = vadd.f32 %v67_v13, %v30_v8  ;;  %v105_v30 = vadd.f32 %v71_v18, %v31_v9  ;;  %v106_v31 = vadd.f32 %v75_v19, %v32_v14  ;;  %v107_v35 = vadd.f32 %v79_v25, %v33_v20 }
  0x17   :  { %v91_v36 = vrot.slane %v54_v28, %v66_v3  ;;  %v108_v38 = vadd.f32 %v83_v32, %v34_v26  ;;  %v109_v39 = vadd.f32 %v87_v33, %v35_v27  ;;  %v95_v42 = vrot.slane %v55_v37, %v66_v3  ;;  %p169_p8 = por %p168_p7, %p167_p6 }
  0x18   :  { %113 = vst.msk [vmem:[#allocation6] sm:$0x3] %vm112_vm0, %v104_v24  ;;  %114 = vst.msk [vmem:[#allocation6 + $0x2] sm:$0x3] %vm112_vm0, %v105_v30 }
  0x19   :  { %115 = vst.msk [vmem:[#allocation6 + $0x4] sm:$0x3] %vm112_vm0, %v106_v31  ;;  %116 = vst.msk [vmem:[#allocation6 + $0x6] sm:$0x3] %vm112_vm0, %v107_v35  ;;  %v110_v41 = vadd.f32 %v91_v36, %v36_v34  ;;  %v111_v43 = vadd.f32 %v95_v42, %v37_v40  ;;  %p170_p9 = pnand %p169_p8, %p163_p5 }
  0x1a   :  { %117 = vst.msk [vmem:[#allocation6 + $0x8] sm:$0x3] %vm112_vm0, %v108_v38  ;;  %118 = vst.msk [vmem:[#allocation6 + $0xa] sm:$0x3] %vm112_vm0, %v109_v39 }
  0x1b   :  { %119 = vst.msk [vmem:[#allocation6 + $0xc] sm:$0x3] %vm112_vm0, %v110_v41  ;;  %120 = vst.msk [vmem:[#allocation6 + $0xe] sm:$0x3] %vm112_vm0, %v111_v43 }
  0x1c   :  { %173 = shalt.err (!%p170_p9)
}
  0x1d   :  { %132 = dma.vmem_to_hbm [thread:$0]  %s127_s9, 256, %s260_s3, [#allocation5], %s187_s15, %s187_s15, %s188_s16  }
  0x1e   :  { %184 = dma.done.wait [#allocation5], 256  }
  0x1f   :  { %185 = vsyncadd [#allocation5], 4294967040 }
  0x20   :  { %136 = vsyncpa [#allocation4], 1 }
  0x21   :  { %137 = vsyncpa [#allocation5], 1 }

</bundles_post_ra>
